<compile_context>
chip_gen: v6e
topology: v6e:2x2x1
jax: 0.10.0
libtpu: 0.0.40
codegen_flags: <defaults>
</compile_context>

<pallas_src>
import jax
import jax.numpy as jnp
from jax import lax
from jax.experimental import pallas as pl
from jax.experimental.pallas import tpu as pltpu


def srl_lstm_kernel(x_ref, w_ih_ref, w_hh_ref, b_ref, w_fc_ref, b_fc_ref,
                    out_ref, h_all_ref, gates_x_ref):
    """Full LSTM recurrence + FC + log_softmax in one kernel (all in VMEM)."""
    T = x_ref.shape[0]
    H = w_hh_ref.shape[0]

    # --- Hoisted input projection: one (T, E) x (E, 4H) MXU matmul + bias,
    # taken off the serial per-step critical path.
    gates_x_ref[...] = (jnp.dot(x_ref[...], w_ih_ref[...],
                                preferred_element_type=jnp.float32)
                        + b_ref[...])                               # (T, 4H)

    def step(t, carry):
        h, c = carry                                                # (1, H), (1, H)
        gates = (gates_x_ref[pl.ds(t, 1), :]
                 + jnp.dot(h, w_hh_ref[...],
                           preferred_element_type=jnp.float32))     # (1, 4H)
        # One sigmoid on the full 4H = 128-lane vreg (same cost as a 32-lane
        # one); i/f/o gates are slices of it.  tanh only on the g slice.
        sig = jax.nn.sigmoid(gates)
        i_g = sig[:, 0:H]
        f_g = sig[:, H:2 * H]
        o_g = sig[:, 3 * H:4 * H]
        g_g = jnp.tanh(gates[:, 2 * H:3 * H])
        c_new = f_g * c + i_g * g_g
        h_new = o_g * jnp.tanh(c_new)
        h_all_ref[pl.ds(t, 1), :] = h_new                           # store h_t
        return (h_new, c_new)

    h0 = jnp.zeros((1, H), jnp.float32)
    c0 = jnp.zeros((1, H), jnp.float32)
    # T is static and small -> fully unroll the recurrence for LLO visibility.
    lax.fori_loop(0, T, step, (h0, c0), unroll=True)

    # --- Fully-connected head on all time steps (one (T, H) x (H, C) matmul).
    hs = h_all_ref[...]                                             # (T, H)
    logits = jnp.dot(hs, w_fc_ref[...],
                     preferred_element_type=jnp.float32) + b_fc_ref[...]  # (T, C)

    # log_softmax over the class axis (dim=1 after the (T, 23) view).
    m = jnp.max(logits, axis=1, keepdims=True)
    z = logits - m
    lse = jnp.log(jnp.sum(jnp.exp(z), axis=1, keepdims=True))
    out_ref[...] = z - lse


def srl_lstm_forward(x, w_ih, w_hh, b_ih, b_hh, w_fc, b_fc):
    """x: (1, T, E) float32 (batch_first; batch must be 1, matching the
    module's `.view(size(1), 23)` contract).  Returns (T, num_class)."""
    assert x.shape[0] == 1, "module's view() only works with batch == 1"
    T, E = x.shape[1], x.shape[2]
    H = w_hh.shape[1]
    C = w_fc.shape[0]

    x2 = x[0].astype(jnp.float32)                            # (T, E)
    w_ih_t = w_ih.T.astype(jnp.float32)                      # (E, 4H)
    w_hh_t = w_hh.T.astype(jnp.float32)                      # (H, 4H)
    b = (b_ih + b_hh).reshape(1, 4 * H).astype(jnp.float32)  # (1, 4H)
    w_fc_t = w_fc.T.astype(jnp.float32)                      # (H, C)
    b_fc2 = b_fc.reshape(1, C).astype(jnp.float32)           # (1, C)

    return pl.pallas_call(
        srl_lstm_kernel,
        out_shape=jax.ShapeDtypeStruct((T, C), jnp.float32),
        in_specs=[pl.BlockSpec(memory_space=pltpu.MemorySpace.VMEM)] * 6,
        out_specs=pl.BlockSpec(memory_space=pltpu.MemorySpace.VMEM),
        scratch_shapes=[
            pltpu.VMEM((T, H), jnp.float32),        # h_all: all hidden states
            pltpu.VMEM((T, 4 * H), jnp.float32),    # gates_x: hoisted x @ W_ih + b
        ],
    )(x2, w_ih_t, w_hh_t, b, w_fc_t, b_fc2)


def _reference(x, w_ih, w_hh, b_ih, b_hh, w_fc, b_fc):
    """Pure-JAX reference matching torch.nn.LSTM + Linear + log_softmax."""
    T = x.shape[1]
    H = w_hh.shape[1]
    h = jnp.zeros((1, H), jnp.float32)
    c = jnp.zeros((1, H), jnp.float32)
    hs = []
    for t in range(T):
        g = x[0, t][None, :] @ w_ih.T + h @ w_hh.T + b_ih + b_hh
        i = jax.nn.sigmoid(g[:, 0:H])
        f = jax.nn.sigmoid(g[:, H:2 * H])
        gg = jnp.tanh(g[:, 2 * H:3 * H])
        o = jax.nn.sigmoid(g[:, 3 * H:4 * H])
        c = f * c + i * gg
        h = o * jnp.tanh(c)
        hs.append(h[0])
    hs = jnp.stack(hs)                                       # (T, H)
    logits = hs @ w_fc.T + b_fc
    return jax.nn.log_softmax(logits, axis=1)


if __name__ == "__main__":
    # Small shapes consistent with the module: batch=1, seq=8, E=16, H=32, C=23.
    E, H, C, T = 16, 32, 23, 8

    key = jax.random.PRNGKey(0)
    ks = jax.random.split(key, 8)
    scale = 1.0 / jnp.sqrt(H)
    x = jax.random.normal(ks[0], (1, T, E), jnp.float32)
    w_ih = jax.random.uniform(ks[1], (4 * H, E), jnp.float32, -scale, scale)
    w_hh = jax.random.uniform(ks[2], (4 * H, H), jnp.float32, -scale, scale)
    b_ih = jax.random.uniform(ks[3], (4 * H,), jnp.float32, -scale, scale)
    b_hh = jax.random.uniform(ks[4], (4 * H,), jnp.float32, -scale, scale)
    w_fc = jax.random.uniform(ks[5], (C, H), jnp.float32, -scale, scale)
    b_fc = jax.random.uniform(ks[6], (C,), jnp.float32, -scale, scale)

    out = srl_lstm_forward(x, w_ih, w_hh, b_ih, b_hh, w_fc, b_fc)
    out = jax.block_until_ready(out)

    ref = _reference(x, w_ih, w_hh, b_ih, b_hh, w_fc, b_fc)
    assert out.shape == (T, C)
    assert jnp.allclose(out, ref, atol=1e-5, rtol=1e-5), "mismatch vs reference"

    print("KERNEL_OK")
</pallas_src>

<mosaic_0001>
module attributes {stable_mosaic.version = 11 : i64} {
  func.func @srl_lstm_kernel(%arg0: memref<8x16xf32, #tpu.memory_space<vmem>>, %arg1: memref<16x128xf32, #tpu.memory_space<vmem>>, %arg2: memref<32x128xf32, #tpu.memory_space<vmem>>, %arg3: memref<1x128xf32, #tpu.memory_space<vmem>>, %arg4: memref<32x23xf32, #tpu.memory_space<vmem>>, %arg5: memref<1x23xf32, #tpu.memory_space<vmem>>, %arg6: memref<8x23xf32, #tpu.memory_space<vmem>>, %arg7: memref<8x32xf32, #tpu.memory_space<vmem>>, %arg8: memref<8x128xf32, #tpu.memory_space<vmem>>) attributes {dimension_semantics = [], scalar_prefetch = 0 : i64, scratch_operands = 2 : i64, tpu.core_type = #tpu.core_type<tc>} {
    %c0 = arith.constant 0 : index
    %c0_0 = arith.constant 0 : index
    %0 = vector.load %arg0[%c0, %c0_0] : memref<8x16xf32, #tpu.memory_space<vmem>>, vector<8x16xf32>
    %c0_1 = arith.constant 0 : index
    %c0_2 = arith.constant 0 : index
    %1 = vector.load %arg1[%c0_1, %c0_2] : memref<16x128xf32, #tpu.memory_space<vmem>>, vector<16x128xf32>
    %cst = arith.constant dense<0.000000e+00> : vector<8x128xf32>
    %2 = tpu.matmul %0, %1, %cst {dimension_numbers = #tpu.dot_dimension_numbers<[1], [0], [0], [1], [0, 0, 1, 1], [], []>} : vector<8x16xf32>, vector<16x128xf32>, vector<8x128xf32> -> vector<8x128xf32>
    %c0_3 = arith.constant 0 : index
    %c0_4 = arith.constant 0 : index
    %3 = vector.load %arg3[%c0_3, %c0_4] : memref<1x128xf32, #tpu.memory_space<vmem>>, vector<1x128xf32>
    %4 = vector.broadcast %3 : vector<1x128xf32> to vector<8x128xf32>
    %5 = arith.addf %2, %4 : vector<8x128xf32>
    %c0_5 = arith.constant 0 : index
    %c0_6 = arith.constant 0 : index
    %6 = vector.load %arg8[%c0_5, %c0_6] : memref<8x128xf32, #tpu.memory_space<vmem>>, vector<8x128xf32>
    tpu.vector_store %arg8[%c0_5, %c0_6], %5 {strides = array<i32>} : memref<8x128xf32, #tpu.memory_space<vmem>>, vector<8x128xf32>,
    %cst_7 = arith.constant 0.000000e+00 : f32
    %7 = vector.broadcast %cst_7 : f32 to vector<1x32xf32>
    %cst_8 = arith.constant 0.000000e+00 : f32
    %8 = vector.broadcast %cst_8 : f32 to vector<1x32xf32>
    %c0_i32 = arith.constant 0 : i32
    %9 = arith.index_cast %c0_i32 : i32 to index
    %c0_9 = arith.constant 0 : index
    %10 = vector.load %arg8[%9, %c0_9] : memref<8x128xf32, #tpu.memory_space<vmem>>, vector<1x128xf32>
    %c0_10 = arith.constant 0 : index
    %c0_11 = arith.constant 0 : index
    %11 = vector.load %arg2[%c0_10, %c0_11] : memref<32x128xf32, #tpu.memory_space<vmem>>, vector<32x128xf32>
    %cst_12 = arith.constant dense<0.000000e+00> : vector<1x128xf32>
    %12 = tpu.matmul %7, %11, %cst_12 {dimension_numbers = #tpu.dot_dimension_numbers<[1], [0], [0], [1], [0, 0, 1, 1], [], []>} : vector<1x32xf32>, vector<32x128xf32>, vector<1x128xf32> -> vector<1x128xf32>
    %13 = arith.addf %10, %12 : vector<1x128xf32>
    %14 = arith.negf %13 : vector<1x128xf32>
    %15 = math.exp %14 : vector<1x128xf32>
    %cst_13 = arith.constant 1.000000e+00 : f32
    %16 = vector.broadcast %cst_13 : f32 to vector<1x128xf32>
    %17 = arith.addf %16, %15 : vector<1x128xf32>
    %18 = arith.divf %16, %17 : vector<1x128xf32>
    %19 = vector.extract_strided_slice %18 {offsets = [0, 0], sizes = [1, 32], strides = [1, 1]} : vector<1x128xf32> to vector<1x32xf32>
    %20 = vector.extract_strided_slice %18 {offsets = [0, 32], sizes = [1, 32], strides = [1, 1]} : vector<1x128xf32> to vector<1x32xf32>
    %21 = vector.extract_strided_slice %18 {offsets = [0, 96], sizes = [1, 32], strides = [1, 1]} : vector<1x128xf32> to vector<1x32xf32>
    %22 = vector.extract_strided_slice %13 {offsets = [0, 64], sizes = [1, 32], strides = [1, 1]} : vector<1x128xf32> to vector<1x32xf32>
    %23 = math.tanh %22 : vector<1x32xf32>
    %24 = arith.mulf %20, %8 : vector<1x32xf32>
    %25 = arith.mulf %19, %23 : vector<1x32xf32>
    %26 = arith.addf %24, %25 : vector<1x32xf32>
    %27 = math.tanh %26 : vector<1x32xf32>
    %28 = arith.mulf %21, %27 : vector<1x32xf32>
    %29 = arith.index_cast %c0_i32 : i32 to index
    %c0_14 = arith.constant 0 : index
    %30 = vector.load %arg7[%29, %c0_14] : memref<8x32xf32, #tpu.memory_space<vmem>>, vector<1x32xf32>
    tpu.vector_store %arg7[%29, %c0_14], %28 {strides = array<i32>} : memref<8x32xf32, #tpu.memory_space<vmem>>, vector<1x32xf32>,
    %c1_i32 = arith.constant 1 : i32
    %31 = arith.index_cast %c1_i32 : i32 to index
    %c0_15 = arith.constant 0 : index
    %32 = vector.load %arg8[%31, %c0_15] : memref<8x128xf32, #tpu.memory_space<vmem>>, vector<1x128xf32>
    %c0_16 = arith.constant 0 : index
    %c0_17 = arith.constant 0 : index
    %33 = vector.load %arg2[%c0_16, %c0_17] : memref<32x128xf32, #tpu.memory_space<vmem>>, vector<32x128xf32>
    %cst_18 = arith.constant dense<0.000000e+00> : vector<1x128xf32>
    %34 = tpu.matmul %28, %33, %cst_18 {dimension_numbers = #tpu.dot_dimension_numbers<[1], [0], [0], [1], [0, 0, 1, 1], [], []>} : vector<1x32xf32>, vector<32x128xf32>, vector<1x128xf32> -> vector<1x128xf32>
    %35 = arith.addf %32, %34 : vector<1x128xf32>
    %36 = arith.negf %35 : vector<1x128xf32>
    %37 = math.exp %36 : vector<1x128xf32>
    %cst_19 = arith.constant 1.000000e+00 : f32
    %38 = vector.broadcast %cst_19 : f32 to vector<1x128xf32>
    %39 = arith.addf %38, %37 : vector<1x128xf32>
    %40 = arith.divf %38, %39 : vector<1x128xf32>
    %41 = vector.extract_strided_slice %40 {offsets = [0, 0], sizes = [1, 32], strides = [1, 1]} : vector<1x128xf32> to vector<1x32xf32>
    %42 = vector.extract_strided_slice %40 {offsets = [0, 32], sizes = [1, 32], strides = [1, 1]} : vector<1x128xf32> to vector<1x32xf32>
    %43 = vector.extract_strided_slice %40 {offsets = [0, 96], sizes = [1, 32], strides = [1, 1]} : vector<1x128xf32> to vector<1x32xf32>
    %44 = vector.extract_strided_slice %35 {offsets = [0, 64], sizes = [1, 32], strides = [1, 1]} : vector<1x128xf32> to vector<1x32xf32>
    %45 = math.tanh %44 : vector<1x32xf32>
    %46 = arith.mulf %42, %26 : vector<1x32xf32>
    %47 = arith.mulf %41, %45 : vector<1x32xf32>
    %48 = arith.addf %46, %47 : vector<1x32xf32>
    %49 = math.tanh %48 : vector<1x32xf32>
    %50 = arith.mulf %43, %49 : vector<1x32xf32>
    %51 = arith.index_cast %c1_i32 : i32 to index
    %c0_20 = arith.constant 0 : index
    %52 = vector.load %arg7[%51, %c0_20] : memref<8x32xf32, #tpu.memory_space<vmem>>, vector<1x32xf32>
    tpu.vector_store %arg7[%51, %c0_20], %50 {strides = array<i32>} : memref<8x32xf32, #tpu.memory_space<vmem>>, vector<1x32xf32>,
    %c2_i32 = arith.constant 2 : i32
    %53 = arith.index_cast %c2_i32 : i32 to index
    %c0_21 = arith.constant 0 : index
    %54 = vector.load %arg8[%53, %c0_21] : memref<8x128xf32, #tpu.memory_space<vmem>>, vector<1x128xf32>
    %c0_22 = arith.constant 0 : index
    %c0_23 = arith.constant 0 : index
    %55 = vector.load %arg2[%c0_22, %c0_23] : memref<32x128xf32, #tpu.memory_space<vmem>>, vector<32x128xf32>
    %cst_24 = arith.constant dense<0.000000e+00> : vector<1x128xf32>
    %56 = tpu.matmul %50, %55, %cst_24 {dimension_numbers = #tpu.dot_dimension_numbers<[1], [0], [0], [1], [0, 0, 1, 1], [], []>} : vector<1x32xf32>, vector<32x128xf32>, vector<1x128xf32> -> vector<1x128xf32>
    %57 = arith.addf %54, %56 : vector<1x128xf32>
    %58 = arith.negf %57 : vector<1x128xf32>
    %59 = math.exp %58 : vector<1x128xf32>
    %cst_25 = arith.constant 1.000000e+00 : f32
    %60 = vector.broadcast %cst_25 : f32 to vector<1x128xf32>
    %61 = arith.addf %60, %59 : vector<1x128xf32>
    %62 = arith.divf %60, %61 : vector<1x128xf32>
    %63 = vector.extract_strided_slice %62 {offsets = [0, 0], sizes = [1, 32], strides = [1, 1]} : vector<1x128xf32> to vector<1x32xf32>
    %64 = vector.extract_strided_slice %62 {offsets = [0, 32], sizes = [1, 32], strides = [1, 1]} : vector<1x128xf32> to vector<1x32xf32>
    %65 = vector.extract_strided_slice %62 {offsets = [0, 96], sizes = [1, 32], strides = [1, 1]} : vector<1x128xf32> to vector<1x32xf32>
    %66 = vector.extract_strided_slice %57 {offsets = [0, 64], sizes = [1, 32], strides = [1, 1]} : vector<1x128xf32> to vector<1x32xf32>
    %67 = math.tanh %66 : vector<1x32xf32>
    %68 = arith.mulf %64, %48 : vector<1x32xf32>
    %69 = arith.mulf %63, %67 : vector<1x32xf32>
    %70 = arith.addf %68, %69 : vector<1x32xf32>
    %71 = math.tanh %70 : vector<1x32xf32>
    %72 = arith.mulf %65, %71 : vector<1x32xf32>
    %73 = arith.index_cast %c2_i32 : i32 to index
    %c0_26 = arith.constant 0 : index
    %74 = vector.load %arg7[%73, %c0_26] : memref<8x32xf32, #tpu.memory_space<vmem>>, vector<1x32xf32>
    tpu.vector_store %arg7[%73, %c0_26], %72 {strides = array<i32>} : memref<8x32xf32, #tpu.memory_space<vmem>>, vector<1x32xf32>,
    %c3_i32 = arith.constant 3 : i32
    %75 = arith.index_cast %c3_i32 : i32 to index
    %c0_27 = arith.constant 0 : index
    %76 = vector.load %arg8[%75, %c0_27] : memref<8x128xf32, #tpu.memory_space<vmem>>, vector<1x128xf32>
    %c0_28 = arith.constant 0 : index
    %c0_29 = arith.constant 0 : index
    %77 = vector.load %arg2[%c0_28, %c0_29] : memref<32x128xf32, #tpu.memory_space<vmem>>, vector<32x128xf32>
    %cst_30 = arith.constant dense<0.000000e+00> : vector<1x128xf32>
    %78 = tpu.matmul %72, %77, %cst_30 {dimension_numbers = #tpu.dot_dimension_numbers<[1], [0], [0], [1], [0, 0, 1, 1], [], []>} : vector<1x32xf32>, vector<32x128xf32>, vector<1x128xf32> -> vector<1x128xf32>
    %79 = arith.addf %76, %78 : vector<1x128xf32>
    %80 = arith.negf %79 : vector<1x128xf32>
    %81 = math.exp %80 : vector<1x128xf32>
    %cst_31 = arith.constant 1.000000e+00 : f32
    %82 = vector.broadcast %cst_31 : f32 to vector<1x128xf32>
    %83 = arith.addf %82, %81 : vector<1x128xf32>
    %84 = arith.divf %82, %83 : vector<1x128xf32>
    %85 = vector.extract_strided_slice %84 {offsets = [0, 0], sizes = [1, 32], strides = [1, 1]} : vector<1x128xf32> to vector<1x32xf32>
    %86 = vector.extract_strided_slice %84 {offsets = [0, 32], sizes = [1, 32], strides = [1, 1]} : vector<1x128xf32> to vector<1x32xf32>
    %87 = vector.extract_strided_slice %84 {offsets = [0, 96], sizes = [1, 32], strides = [1, 1]} : vector<1x128xf32> to vector<1x32xf32>
    %88 = vector.extract_strided_slice %79 {offsets = [0, 64], sizes = [1, 32], strides = [1, 1]} : vector<1x128xf32> to vector<1x32xf32>
    %89 = math.tanh %88 : vector<1x32xf32>
    %90 = arith.mulf %86, %70 : vector<1x32xf32>
    %91 = arith.mulf %85, %89 : vector<1x32xf32>
    %92 = arith.addf %90, %91 : vector<1x32xf32>
    %93 = math.tanh %92 : vector<1x32xf32>
    %94 = arith.mulf %87, %93 : vector<1x32xf32>
    %95 = arith.index_cast %c3_i32 : i32 to index
    %c0_32 = arith.constant 0 : index
    %96 = vector.load %arg7[%95, %c0_32] : memref<8x32xf32, #tpu.memory_space<vmem>>, vector<1x32xf32>
    tpu.vector_store %arg7[%95, %c0_32], %94 {strides = array<i32>} : memref<8x32xf32, #tpu.memory_space<vmem>>, vector<1x32xf32>,
    %c4_i32 = arith.constant 4 : i32
    %97 = arith.index_cast %c4_i32 : i32 to index
    %c0_33 = arith.constant 0 : index
    %98 = vector.load %arg8[%97, %c0_33] : memref<8x128xf32, #tpu.memory_space<vmem>>, vector<1x128xf32>
    %c0_34 = arith.constant 0 : index
    %c0_35 = arith.constant 0 : index
    %99 = vector.load %arg2[%c0_34, %c0_35] : memref<32x128xf32, #tpu.memory_space<vmem>>, vector<32x128xf32>
    %cst_36 = arith.constant dense<0.000000e+00> : vector<1x128xf32>
    %100 = tpu.matmul %94, %99, %cst_36 {dimension_numbers = #tpu.dot_dimension_numbers<[1], [0], [0], [1], [0, 0, 1, 1], [], []>} : vector<1x32xf32>, vector<32x128xf32>, vector<1x128xf32> -> vector<1x128xf32>
    %101 = arith.addf %98, %100 : vector<1x128xf32>
    %102 = arith.negf %101 : vector<1x128xf32>
    %103 = math.exp %102 : vector<1x128xf32>
    %cst_37 = arith.constant 1.000000e+00 : f32
    %104 = vector.broadcast %cst_37 : f32 to vector<1x128xf32>
    %105 = arith.addf %104, %103 : vector<1x128xf32>
    %106 = arith.divf %104, %105 : vector<1x128xf32>
    %107 = vector.extract_strided_slice %106 {offsets = [0, 0], sizes = [1, 32], strides = [1, 1]} : vector<1x128xf32> to vector<1x32xf32>
    %108 = vector.extract_strided_slice %106 {offsets = [0, 32], sizes = [1, 32], strides = [1, 1]} : vector<1x128xf32> to vector<1x32xf32>
    %109 = vector.extract_strided_slice %106 {offsets = [0, 96], sizes = [1, 32], strides = [1, 1]} : vector<1x128xf32> to vector<1x32xf32>
    %110 = vector.extract_strided_slice %101 {offsets = [0, 64], sizes = [1, 32], strides = [1, 1]} : vector<1x128xf32> to vector<1x32xf32>
    %111 = math.tanh %110 : vector<1x32xf32>
    %112 = arith.mulf %108, %92 : vector<1x32xf32>
    %113 = arith.mulf %107, %111 : vector<1x32xf32>
    %114 = arith.addf %112, %113 : vector<1x32xf32>
    %115 = math.tanh %114 : vector<1x32xf32>
    %116 = arith.mulf %109, %115 : vector<1x32xf32>
    %117 = arith.index_cast %c4_i32 : i32 to index
    %c0_38 = arith.constant 0 : index
    %118 = vector.load %arg7[%117, %c0_38] : memref<8x32xf32, #tpu.memory_space<vmem>>, vector<1x32xf32>
    tpu.vector_store %arg7[%117, %c0_38], %116 {strides = array<i32>} : memref<8x32xf32, #tpu.memory_space<vmem>>, vector<1x32xf32>,
    %c5_i32 = arith.constant 5 : i32
    %119 = arith.index_cast %c5_i32 : i32 to index
    %c0_39 = arith.constant 0 : index
    %120 = vector.load %arg8[%119, %c0_39] : memref<8x128xf32, #tpu.memory_space<vmem>>, vector<1x128xf32>
    %c0_40 = arith.constant 0 : index
    %c0_41 = arith.constant 0 : index
    %121 = vector.load %arg2[%c0_40, %c0_41] : memref<32x128xf32, #tpu.memory_space<vmem>>, vector<32x128xf32>
    %cst_42 = arith.constant dense<0.000000e+00> : vector<1x128xf32>
    %122 = tpu.matmul %116, %121, %cst_42 {dimension_numbers = #tpu.dot_dimension_numbers<[1], [0], [0], [1], [0, 0, 1, 1], [], []>} : vector<1x32xf32>, vector<32x128xf32>, vector<1x128xf32> -> vector<1x128xf32>
    %123 = arith.addf %120, %122 : vector<1x128xf32>
    %124 = arith.negf %123 : vector<1x128xf32>
    %125 = math.exp %124 : vector<1x128xf32>
    %cst_43 = arith.constant 1.000000e+00 : f32
    %126 = vector.broadcast %cst_43 : f32 to vector<1x128xf32>
    %127 = arith.addf %126, %125 : vector<1x128xf32>
    %128 = arith.divf %126, %127 : vector<1x128xf32>
    %129 = vector.extract_strided_slice %128 {offsets = [0, 0], sizes = [1, 32], strides = [1, 1]} : vector<1x128xf32> to vector<1x32xf32>
    %130 = vector.extract_strided_slice %128 {offsets = [0, 32], sizes = [1, 32], strides = [1, 1]} : vector<1x128xf32> to vector<1x32xf32>
    %131 = vector.extract_strided_slice %128 {offsets = [0, 96], sizes = [1, 32], strides = [1, 1]} : vector<1x128xf32> to vector<1x32xf32>
    %132 = vector.extract_strided_slice %123 {offsets = [0, 64], sizes = [1, 32], strides = [1, 1]} : vector<1x128xf32> to vector<1x32xf32>
    %133 = math.tanh %132 : vector<1x32xf32>
    %134 = arith.mulf %130, %114 : vector<1x32xf32>
    %135 = arith.mulf %129, %133 : vector<1x32xf32>
    %136 = arith.addf %134, %135 : vector<1x32xf32>
    %137 = math.tanh %136 : vector<1x32xf32>
    %138 = arith.mulf %131, %137 : vector<1x32xf32>
    %139 = arith.index_cast %c5_i32 : i32 to index
    %c0_44 = arith.constant 0 : index
    %140 = vector.load %arg7[%139, %c0_44] : memref<8x32xf32, #tpu.memory_space<vmem>>, vector<1x32xf32>
    tpu.vector_store %arg7[%139, %c0_44], %138 {strides = array<i32>} : memref<8x32xf32, #tpu.memory_space<vmem>>, vector<1x32xf32>,
    %c6_i32 = arith.constant 6 : i32
    %141 = arith.index_cast %c6_i32 : i32 to index
    %c0_45 = arith.constant 0 : index
    %142 = vector.load %arg8[%141, %c0_45] : memref<8x128xf32, #tpu.memory_space<vmem>>, vector<1x128xf32>
    %c0_46 = arith.constant 0 : index
    %c0_47 = arith.constant 0 : index
    %143 = vector.load %arg2[%c0_46, %c0_47] : memref<32x128xf32, #tpu.memory_space<vmem>>, vector<32x128xf32>
    %cst_48 = arith.constant dense<0.000000e+00> : vector<1x128xf32>
    %144 = tpu.matmul %138, %143, %cst_48 {dimension_numbers = #tpu.dot_dimension_numbers<[1], [0], [0], [1], [0, 0, 1, 1], [], []>} : vector<1x32xf32>, vector<32x128xf32>, vector<1x128xf32> -> vector<1x128xf32>
    %145 = arith.addf %142, %144 : vector<1x128xf32>
    %146 = arith.negf %145 : vector<1x128xf32>
    %147 = math.exp %146 : vector<1x128xf32>
    %cst_49 = arith.constant 1.000000e+00 : f32
    %148 = vector.broadcast %cst_49 : f32 to vector<1x128xf32>
    %149 = arith.addf %148, %147 : vector<1x128xf32>
    %150 = arith.divf %148, %149 : vector<1x128xf32>
    %151 = vector.extract_strided_slice %150 {offsets = [0, 0], sizes = [1, 32], strides = [1, 1]} : vector<1x128xf32> to vector<1x32xf32>
    %152 = vector.extract_strided_slice %150 {offsets = [0, 32], sizes = [1, 32], strides = [1, 1]} : vector<1x128xf32> to vector<1x32xf32>
    %153 = vector.extract_strided_slice %150 {offsets = [0, 96], sizes = [1, 32], strides = [1, 1]} : vector<1x128xf32> to vector<1x32xf32>
    %154 = vector.extract_strided_slice %145 {offsets = [0, 64], sizes = [1, 32], strides = [1, 1]} : vector<1x128xf32> to vector<1x32xf32>
    %155 = math.tanh %154 : vector<1x32xf32>
    %156 = arith.mulf %152, %136 : vector<1x32xf32>
    %157 = arith.mulf %151, %155 : vector<1x32xf32>
    %158 = arith.addf %156, %157 : vector<1x32xf32>
    %159 = math.tanh %158 : vector<1x32xf32>
    %160 = arith.mulf %153, %159 : vector<1x32xf32>
    %161 = arith.index_cast %c6_i32 : i32 to index
    %c0_50 = arith.constant 0 : index
    %162 = vector.load %arg7[%161, %c0_50] : memref<8x32xf32, #tpu.memory_space<vmem>>, vector<1x32xf32>
    tpu.vector_store %arg7[%161, %c0_50], %160 {strides = array<i32>} : memref<8x32xf32, #tpu.memory_space<vmem>>, vector<1x32xf32>,
    %c7_i32 = arith.constant 7 : i32
    %163 = arith.index_cast %c7_i32 : i32 to index
    %c0_51 = arith.constant 0 : index
    %164 = vector.load %arg8[%163, %c0_51] : memref<8x128xf32, #tpu.memory_space<vmem>>, vector<1x128xf32>
    %c0_52 = arith.constant 0 : index
    %c0_53 = arith.constant 0 : index
    %165 = vector.load %arg2[%c0_52, %c0_53] : memref<32x128xf32, #tpu.memory_space<vmem>>, vector<32x128xf32>
    %cst_54 = arith.constant dense<0.000000e+00> : vector<1x128xf32>
    %166 = tpu.matmul %160, %165, %cst_54 {dimension_numbers = #tpu.dot_dimension_numbers<[1], [0], [0], [1], [0, 0, 1, 1], [], []>} : vector<1x32xf32>, vector<32x128xf32>, vector<1x128xf32> -> vector<1x128xf32>
    %167 = arith.addf %164, %166 : vector<1x128xf32>
    %168 = arith.negf %167 : vector<1x128xf32>
    %169 = math.exp %168 : vector<1x128xf32>
    %cst_55 = arith.constant 1.000000e+00 : f32
    %170 = vector.broadcast %cst_55 : f32 to vector<1x128xf32>
    %171 = arith.addf %170, %169 : vector<1x128xf32>
    %172 = arith.divf %170, %171 : vector<1x128xf32>
    %173 = vector.extract_strided_slice %172 {offsets = [0, 0], sizes = [1, 32], strides = [1, 1]} : vector<1x128xf32> to vector<1x32xf32>
    %174 = vector.extract_strided_slice %172 {offsets = [0, 32], sizes = [1, 32], strides = [1, 1]} : vector<1x128xf32> to vector<1x32xf32>
    %175 = vector.extract_strided_slice %172 {offsets = [0, 96], sizes = [1, 32], strides = [1, 1]} : vector<1x128xf32> to vector<1x32xf32>
    %176 = vector.extract_strided_slice %167 {offsets = [0, 64], sizes = [1, 32], strides = [1, 1]} : vector<1x128xf32> to vector<1x32xf32>
    %177 = math.tanh %176 : vector<1x32xf32>
    %178 = arith.mulf %174, %158 : vector<1x32xf32>
    %179 = arith.mulf %173, %177 : vector<1x32xf32>
    %180 = arith.addf %178, %179 : vector<1x32xf32>
    %181 = math.tanh %180 : vector<1x32xf32>
    %182 = arith.mulf %175, %181 : vector<1x32xf32>
    %183 = arith.index_cast %c7_i32 : i32 to index
    %c0_56 = arith.constant 0 : index
    %184 = vector.load %arg7[%183, %c0_56] : memref<8x32xf32, #tpu.memory_space<vmem>>, vector<1x32xf32>
    tpu.vector_store %arg7[%183, %c0_56], %182 {strides = array<i32>} : memref<8x32xf32, #tpu.memory_space<vmem>>, vector<1x32xf32>,
    %c8_i32 = arith.constant 8 : i32
    %c0_57 = arith.constant 0 : index
    %c0_58 = arith.constant 0 : index
    %185 = vector.load %arg7[%c0_57, %c0_58] : memref<8x32xf32, #tpu.memory_space<vmem>>, vector<8x32xf32>
    %c0_59 = arith.constant 0 : index
    %c0_60 = arith.constant 0 : index
    %186 = vector.load %arg4[%c0_59, %c0_60] : memref<32x23xf32, #tpu.memory_space<vmem>>, vector<32x23xf32>
    %cst_61 = arith.constant dense<0.000000e+00> : vector<8x23xf32>
    %187 = tpu.matmul %185, %186, %cst_61 {dimension_numbers = #tpu.dot_dimension_numbers<[1], [0], [0], [1], [0, 0, 1, 1], [], []>} : vector<8x32xf32>, vector<32x23xf32>, vector<8x23xf32> -> vector<8x23xf32>
    %c0_62 = arith.constant 0 : index
    %c0_63 = arith.constant 0 : index
    %188 = vector.load %arg5[%c0_62, %c0_63] : memref<1x23xf32, #tpu.memory_space<vmem>>, vector<1x23xf32>
    %189 = vector.broadcast %188 : vector<1x23xf32> to vector<8x23xf32>
    %190 = arith.addf %187, %189 : vector<8x23xf32>
    %cst_64 = arith.constant dense<0xFF800000> : vector<8xf32>
    %191 = vector.multi_reduction <maximumf>, %190, %cst_64 [1] : vector<8x23xf32> to vector<8xf32>
    %192 = vector.shape_cast %191 : vector<8xf32> to vector<8x1xf32>
    %193 = vector.broadcast %192 : vector<8x1xf32> to vector<8x23xf32>
    %194 = arith.subf %190, %193 : vector<8x23xf32>
    %195 = math.exp %194 : vector<8x23xf32>
    %cst_65 = arith.constant dense<0.000000e+00> : vector<8xf32>
    %196 = vector.multi_reduction <add>, %195, %cst_65 [1] : vector<8x23xf32> to vector<8xf32>
    %197 = vector.shape_cast %196 : vector<8xf32> to vector<8x1xf32>
    %198 = math.log %197 : vector<8x1xf32>
    %199 = vector.broadcast %198 : vector<8x1xf32> to vector<8x23xf32>
    %200 = arith.subf %194, %199 : vector<8x23xf32>
    %c0_66 = arith.constant 0 : index
    %c0_67 = arith.constant 0 : index
    %201 = vector.load %arg6[%c0_66, %c0_67] : memref<8x23xf32, #tpu.memory_space<vmem>>, vector<8x23xf32>
    tpu.vector_store %arg6[%c0_66, %c0_67], %200 {strides = array<i32>} : memref<8x23xf32, #tpu.memory_space<vmem>>, vector<8x23xf32>,
    return
  }
}

</mosaic_0001>

<bundles_post_ra>
// kernel: tpu_custom_call.1
= control target key start
LH: loop header
LB: loop body
LE: loop exit
PB: predicated region body
PF: predicated region fallthrough
CT: control target
= control target key end

     0   :  { %v1349_v1 = vmov 0.0   ;;  %vm1350_vm0 = vmmov 0   ;;  %vm34_vm1 = vcmask 130048   ;;  %s1581_s0 = inlined_call_operand.vmem [shape: f32[8,16], index: 0, kind: input, shape index: {}]   ;;  %s1582_s1 = inlined_call_operand.vmem [shape: f32[16,128], index: 1, kind: input, shape index: {}]   ;;  %s1583_s2 = inlined_call_operand.vmem [shape: f32[32,128], index: 2, kind: input, shape index: {}]   ;;  %s1584_s3 = inlined_call_operand.vmem [shape: f32[1,128], index: 3, kind: input, shape index: {}]   ;;  %s1585_s4 = inlined_call_operand.vmem [shape: f32[32,23], index: 4, kind: input, shape index: {}]   ;;  %s1586_s5 = inlined_call_operand.vmem [shape: f32[1,23], index: 5, kind: input, shape index: {}]   ;;  %s1587_s6 = inlined_call_operand.hbm [shape: f32[8,23], index: 6, kind: output, shape index: {}]  }
   0x1   :  { %v26_v0 = vld [vmem:[%s1582_s1 + $0x8] sm:$0xff]  ;;  %1148 = vmatprep.subr.mxu0 %v1349_v1  ;;  %v25_v2 = vld [vmem:[%s1582_s1] sm:$0xff]  ;;  %1152 = vmatprep.mubr.msk.f32.mxu0 %vm1350_vm0, %v1349_v1  ;;  %v1401_v3 = vld [vmem:[%s1583_s2 + $0x18] sm:$0xff] }
   0x2   :  { %1149 = vmatpush3.msra.mxu0 %v26_v0  ;;  %v24_v4 = vld [vmem:[%s1581_s0] sm:$0xff]  ;;  %1155 = vmatprep.subr.mxu1 %v1349_v1  ;;  %v1410_v5 = vld [vmem:[%s1583_s2 + $0x10] sm:$0xff] }
   0x3   :  { %11 = vsyncpa [#allocation5], 0  ;;  %1150 = vmatprep.subr.mxu0 %v1349_v1  ;;  %1156 = vmatpush3.msra.mxu1 %v1401_v3  ;;  %v1418_v6 = vld [vmem:[%s1583_s2 + $0x8] sm:$0xff]  ;;  %v1425_v7 = vld [vmem:[%s1583_s2] sm:$0xff]  ;;  %s1351_s10 = smov 64   ;;  %vm217_vm2 = vcmask 253952  }
   0x4   :  { %1151 = vmatpush3.msra.mxu0 %v25_v2  ;;  %1157 = vmatprep.subr.mxu1 %v1349_v1  ;;  %v1081_v8 = vld [vmem:[%s1584_s3] ss:$0 sm:$0xff]  ;;  %s1352_s3 = smov 32   ;;  %vm114_vm3 = vcmask 261120   ;;  %vm1053_vm4 = vcmask 187392  }
   0x5   :  { %1153 = vmatmul.mubr.msk.f32.vlgmr.msra.gmra.mxu0 %vm34_vm1, %v24_v4  ;;  %1158 = vmatpush3.msra.mxu1 %v1410_v5 }
   0x6   :  { %1159 = vmatprep.subr.mxu1 %v1349_v1  ;;  %1163 = vmatprep.mubr.msk.f32.mxu1 %vm1350_vm0, %v1349_v1 }
   0x7   :  { %1160 = vmatpush3.msra.mxu1 %v1418_v6  ;;  %1166 = vmatprep.subr.mxu0 %v1349_v1 }
   0x8   :  { %1161 = vmatprep.subr.mxu1 %v1349_v1  ;;  %1167 = vmatpush3.msra.mxu0 %v1401_v3 }
   0x9   :  { %1162 = vmatpush3.msra.mxu1 %v1425_v7  ;;  %1168 = vmatprep.subr.mxu0 %v1349_v1 }
   0xa   :  { %1164 = vmatmul.mubr.f32.vlgmr.msra.gmra.mxu1 %v1349_v1  ;;  %1169 = vmatpush3.msra.mxu0 %v1410_v5 }
   0xb   :  { %1170 = vmatprep.subr.mxu0 %v1349_v1  ;;  %1174 = vmatprep.mubr.msk.f32.mxu0 %vm1350_vm0, %v1349_v1 }
   0xc   :  { %1171 = vmatpush3.msra.mxu0 %v1418_v6  ;;  %1177 = vmatprep.subr.mxu1 %v1349_v1 }
   0xd   :  { %1172 = vmatprep.subr.mxu0 %v1349_v1  ;;  %1178 = vmatpush3.msra.mxu1 %v1401_v3 }
   0xe   :  { %1173 = vmatpush3.msra.mxu0 %v1425_v7  ;;  %1179 = vmatprep.subr.mxu1 %v1349_v1 }
   0xf   :  { %1180 = vmatpush3.msra.mxu1 %v1410_v5  ;;  %1185 = vmatprep.mubr.msk.f32.mxu1 %vm1350_vm0, %v1349_v1 }
  0x10   :  { %1181 = vmatprep.subr.mxu1 %v1349_v1  ;;  %1188 = vmatprep.subr.mxu0 %v1349_v1 }
  0x11   :  { %1182 = vmatpush3.msra.mxu1 %v1418_v6 }
  0x12   :  { %1183 = vmatprep.subr.mxu1 %v1349_v1 }
  0x13   :  { %1184 = vmatpush3.msra.mxu1 %v1425_v7 }
  0x14   :  { %1199 = vmatprep.subr.mxu1 %v1349_v1 }
  0xc5   :  { %v104_v9 = vpop.f32.mrf.mxu0 }
  0xc6   :  { %v105_v10 = vadd.f32 %v1081_v8, %v104_v9 }
  0xc7   :  { %v1154_v11 = vpop.f32.mrf.mxu0 }
  0xc8   :  { %108 = vst [vmem:[#allocation3] sm:$0xff] %v105_v10 }
  0xca   :  { %v184_v12 = vpop.f32.mrf.mxu1 }
  0xcc   :  { %v1165_v13 = vpop.f32.mrf.mxu1 }
  0xcf   :  { %v109_v14 = vld [vmem:[#allocation3] sm:$0x1]  ;;  %v219_v30 = vld [vmem:[#allocation3 + $0x1] sm:$0x1]  ;;  %v326_v48 = vld [vmem:[#allocation3 + $0x2] sm:$0x1] }
  0xd0   :  { %v188_v15 = vadd.f32 %v184_v12, %v109_v14  ;;  %v433_v4 = vld [vmem:[#allocation3 + $0x3] sm:$0x1] }
  0xd2   :  { %1259 = vtanh.f32 %v188_v15  ;;  %v1083_v17 = vmul.f32 -1.442695, %v188_v15 }
  0xd4   :  { %1261 = vpow2.f32 %v1083_v17 }
  0xdf   :  { %v1260_v16 = vpop.eup %1259 }
  0xe0   :  { %198 = vrot.lane.b32.xlu0 %v1260_v16, %s1351_s10 }
  0xe1   :  { %v1262_v18 = vpop.eup %1261 }
  0xe2   :  { %v192_v19 = vadd.f32 1.0, %v1262_v18 }
  0xe4   :  { %1263 = vrcp.f32 %v192_v19 }
  0xf1   :  { %v1264_v20 = vpop.eup %1263 }
  0xf2   :  { %v196_v23 = vmul.f32 0.0, %v1264_v20 }
 0x152   :  { %v199_v21 = vpop.permute.xlu0 %198 }
 0x153   :  { %v201_v22 = vmul.f32 %v1264_v20, %v199_v21 }
 0x155   :  { %203 = vrot.lane.b32.xlu0 %v201_v22, %s1352_s3 }
 0x1c7   :  { %v204_v24 = vpop.permute.xlu0 %203 }
 0x1c8   :  { %v206_v25 = vadd.f32 %v204_v24, %v196_v23 }
 0x1ca   :  { %1265 = vtanh.f32 %v206_v25 }
 0x1d7   :  { %v1266_v26 = vpop.eup %1265 }
 0x1d8   :  { %209 = vrot.lane.b32.xlu1 %v1266_v26, %s1351_s10 }
 0x24a   :  { %v210_v27 = vpop.permute.xlu1 %209 }
 0x24b   :  { %v212_v28 = vmul.f32 %v1264_v20, %v210_v27 }
 0x24d   :  { %214 = vrot.lane.b32.xlu1 %v212_v28, %s1352_s3 }
 0x2bf   :  { %v215_v29 = vpop.permute.xlu1 %214 }
 0x2c0   :  { %218 = vst.msk [vmem:[#allocation2] sm:$0x1] %vm217_vm2, %v215_v29  ;;  %1175 = vmatmul.mubr.msk.f32.vlgmr.msra.gmra.mxu0 %vm114_vm3, %v215_v29 }
 0x2c1   :  { %1189 = vmatpush3.msra.mxu0 %v1401_v3  ;;  %1196 = vmatprep.mubr.msk.f32.mxu0 %vm1350_vm0, %v1349_v1 }
 0x2c2   :  { %1190 = vmatprep.subr.mxu0 %v1349_v1 }
 0x2c3   :  { %1191 = vmatpush3.msra.mxu0 %v1410_v5 }
 0x2c4   :  { %1192 = vmatprep.subr.mxu0 %v1349_v1 }
 0x2c5   :  { %1193 = vmatpush3.msra.mxu0 %v1418_v6 }
 0x2c6   :  { %1194 = vmatprep.subr.mxu0 %v1349_v1 }
 0x2c7   :  { %1195 = vmatpush3.msra.mxu0 %v1425_v7 }
 0x2c8   :  { %1210 = vmatprep.subr.mxu0 %v1349_v1 }
 0x380   :  { %v292_v31 = vpop.f32.mrf.mxu0 }
 0x381   :  { %v296_v32 = vadd.f32 %v292_v31, %v219_v30 }
 0x382   :  { %v1176_v33 = vpop.f32.mrf.mxu0 }
 0x383   :  { %1267 = vtanh.f32 %v296_v32  ;;  %v1085_v35 = vmul.f32 -1.442695, %v296_v32 }
 0x385   :  { %1269 = vpow2.f32 %v1085_v35 }
 0x390   :  { %v1268_v34 = vpop.eup %1267 }
 0x391   :  { %306 = vrot.lane.b32.xlu0 %v1268_v34, %s1351_s10 }
 0x392   :  { %v1270_v36 = vpop.eup %1269 }
 0x393   :  { %v300_v37 = vadd.f32 1.0, %v1270_v36 }
 0x395   :  { %1271 = vrcp.f32 %v300_v37 }
 0x3a2   :  { %v1272_v38 = vpop.eup %1271 }
 0x3a3   :  { %v304_v41 = vmul.f32 %v1272_v38, %v206_v25  ;;  %v540_v25 = vld [vmem:[#allocation3 + $0x4] sm:$0x1] }
 0x403   :  { %v307_v39 = vpop.permute.xlu0 %306 }
 0x404   :  { %v309_v40 = vmul.f32 %v1272_v38, %v307_v39 }
 0x406   :  { %311 = vrot.lane.b32.xlu1 %v309_v40, %s1352_s3 }
 0x478   :  { %v312_v42 = vpop.permute.xlu1 %311 }
 0x479   :  { %v314_v43 = vadd.f32 %v312_v42, %v304_v41 }
 0x47b   :  { %1273 = vtanh.f32 %v314_v43 }
 0x488   :  { %v1274_v44 = vpop.eup %1273 }
 0x489   :  { %317 = vrot.lane.b32.xlu0 %v1274_v44, %s1351_s10 }
 0x4fb   :  { %v318_v45 = vpop.permute.xlu0 %317 }
 0x4fc   :  { %v320_v46 = vmul.f32 %v1272_v38, %v318_v45 }
 0x4fe   :  { %322 = vrot.lane.b32.xlu1 %v320_v46, %s1352_s3 }
 0x570   :  { %v323_v47 = vpop.permute.xlu1 %322 }
 0x571   :  { %325 = vst.msk [vmem:[#allocation2 + $0x1] sm:$0x1] %vm217_vm2, %v323_v47  ;;  %1186 = vmatmul.mubr.msk.f32.vlgmr.msra.gmra.mxu1 %vm114_vm3, %v323_v47 }
 0x572   :  { %1200 = vmatpush3.msra.mxu1 %v1401_v3  ;;  %1207 = vmatprep.mubr.msk.f32.mxu1 %vm1350_vm0, %v1349_v1 }
 0x573   :  { %1201 = vmatprep.subr.mxu1 %v1349_v1 }
 0x574   :  { %1202 = vmatpush3.msra.mxu1 %v1410_v5 }
 0x575   :  { %1203 = vmatprep.subr.mxu1 %v1349_v1 }
 0x576   :  { %1204 = vmatpush3.msra.mxu1 %v1418_v6 }
 0x577   :  { %1205 = vmatprep.subr.mxu1 %v1349_v1 }
 0x578   :  { %1206 = vmatpush3.msra.mxu1 %v1425_v7 }
 0x579   :  { %1221 = vmatprep.subr.mxu1 %v1349_v1 }
 0x631   :  { %v399_v49 = vpop.f32.mrf.mxu1 }
 0x632   :  { %v403_v50 = vadd.f32 %v399_v49, %v326_v48 }
 0x633   :  { %v1187_v51 = vpop.f32.mrf.mxu1 }
 0x634   :  { %1275 = vtanh.f32 %v403_v50  ;;  %v1087_v53 = vmul.f32 -1.442695, %v403_v50 }
 0x636   :  { %1277 = vpow2.f32 %v1087_v53 }
 0x641   :  { %v1276_v52 = vpop.eup %1275 }
 0x642   :  { %413 = vrot.lane.b32.xlu0 %v1276_v52, %s1351_s10 }
 0x643   :  { %v1278_v54 = vpop.eup %1277 }
 0x644   :  { %v407_v55 = vadd.f32 1.0, %v1278_v54 }
 0x646   :  { %1279 = vrcp.f32 %v407_v55 }
 0x653   :  { %v1280_v56 = vpop.eup %1279 }
 0x654   :  { %v411_v59 = vmul.f32 %v1280_v56, %v314_v43  ;;  %v647_v43 = vld [vmem:[#allocation3 + $0x5] sm:$0x1] }
 0x6b4   :  { %v414_v57 = vpop.permute.xlu0 %413 }
 0x6b5   :  { %v416_v58 = vmul.f32 %v1280_v56, %v414_v57  ;;  %v754_v57 = vld [vmem:[#allocation3 + $0x6] sm:$0x1] }
 0x6b7   :  { %418 = vrot.lane.b32.xlu1 %v416_v58, %s1352_s3 }
 0x729   :  { %v419_v60 = vpop.permute.xlu1 %418 }
 0x72a   :  { %v421_v61 = vadd.f32 %v419_v60, %v411_v59 }
 0x72c   :  { %1281 = vtanh.f32 %v421_v61 }
 0x739   :  { %v1282_v62 = vpop.eup %1281 }
 0x73a   :  { %424 = vrot.lane.b32.xlu0 %v1282_v62, %s1351_s10 }
 0x7ac   :  { %v425_v63 = vpop.permute.xlu0 %424 }
 0x7ad   :  { %v427_v0 = vmul.f32 %v1280_v56, %v425_v63 }
 0x7af   :  { %429 = vrot.lane.b32.xlu1 %v427_v0, %s1352_s3 }
 0x821   :  { %v430_v2 = vpop.permute.xlu1 %429 }
 0x822   :  { %432 = vst.msk [vmem:[#allocation2 + $0x2] sm:$0x1] %vm217_vm2, %v430_v2  ;;  %1197 = vmatmul.mubr.msk.f32.vlgmr.msra.gmra.mxu0 %vm114_vm3, %v430_v2 }
 0x823   :  { %1211 = vmatpush3.msra.mxu0 %v1401_v3  ;;  %1218 = vmatprep.mubr.msk.f32.mxu0 %vm1350_vm0, %v1349_v1 }
 0x824   :  { %1212 = vmatprep.subr.mxu0 %v1349_v1 }
 0x825   :  { %1213 = vmatpush3.msra.mxu0 %v1410_v5 }
 0x826   :  { %1214 = vmatprep.subr.mxu0 %v1349_v1 }
 0x827   :  { %1215 = vmatpush3.msra.mxu0 %v1418_v6 }
 0x828   :  { %1216 = vmatprep.subr.mxu0 %v1349_v1 }
 0x829   :  { %1217 = vmatpush3.msra.mxu0 %v1425_v7 }
 0x82a   :  { %1232 = vmatprep.subr.mxu0 %v1349_v1 }
 0x8e2   :  { %v506_v8 = vpop.f32.mrf.mxu0 }
 0x8e3   :  { %v510_v9 = vadd.f32 %v506_v8, %v433_v4 }
 0x8e4   :  { %v1198_v10 = vpop.f32.mrf.mxu0 }
 0x8e5   :  { %1283 = vtanh.f32 %v510_v9  ;;  %v1089_v12 = vmul.f32 -1.442695, %v510_v9 }
 0x8e7   :  { %1285 = vpow2.f32 %v1089_v12 }
 0x8f2   :  { %v1284_v11 = vpop.eup %1283 }
 0x8f3   :  { %520 = vrot.lane.b32.xlu0 %v1284_v11, %s1351_s10 }
 0x8f4   :  { %v1286_v13 = vpop.eup %1285 }
 0x8f5   :  { %v514_v14 = vadd.f32 1.0, %v1286_v13 }
 0x8f7   :  { %1287 = vrcp.f32 %v514_v14 }
 0x904   :  { %v1288_v15 = vpop.eup %1287 }
 0x905   :  { %v518_v18 = vmul.f32 %v1288_v15, %v421_v61 }
 0x965   :  { %v521_v16 = vpop.permute.xlu0 %520 }
 0x966   :  { %v523_v17 = vmul.f32 %v1288_v15, %v521_v16  ;;  %v861_v16 = vld [vmem:[#allocation3 + $0x7] sm:$0x1] }
 0x968   :  { %525 = vrot.lane.b32.xlu1 %v523_v17, %s1352_s3 }
 0x9da   :  { %v526_v19 = vpop.permute.xlu1 %525 }
 0x9db   :  { %v528_v20 = vadd.f32 %v526_v19, %v518_v18 }
 0x9dd   :  { %1289 = vtanh.f32 %v528_v20 }
 0x9ea   :  { %v1290_v21 = vpop.eup %1289 }
 0x9eb   :  { %531 = vrot.lane.b32.xlu0 %v1290_v21, %s1351_s10 }
 0xa5d   :  { %v532_v22 = vpop.permute.xlu0 %531 }
 0xa5e   :  { %v534_v23 = vmul.f32 %v1288_v15, %v532_v22 }
 0xa60   :  { %536 = vrot.lane.b32.xlu1 %v534_v23, %s1352_s3 }
 0xad2   :  { %v537_v24 = vpop.permute.xlu1 %536 }
 0xad3   :  { %539 = vst.msk [vmem:[#allocation2 + $0x3] sm:$0x1] %vm217_vm2, %v537_v24  ;;  %1208 = vmatmul.mubr.msk.f32.vlgmr.msra.gmra.mxu1 %vm114_vm3, %v537_v24 }
 0xad4   :  { %1222 = vmatpush3.msra.mxu1 %v1401_v3  ;;  %1229 = vmatprep.mubr.msk.f32.mxu1 %vm1350_vm0, %v1349_v1 }
 0xad5   :  { %1223 = vmatprep.subr.mxu1 %v1349_v1 }
 0xad6   :  { %1224 = vmatpush3.msra.mxu1 %v1410_v5 }
 0xad7   :  { %1225 = vmatprep.subr.mxu1 %v1349_v1 }
 0xad8   :  { %1226 = vmatpush3.msra.mxu1 %v1418_v6 }
 0xad9   :  { %1227 = vmatprep.subr.mxu1 %v1349_v1 }
 0xada   :  { %1228 = vmatpush3.msra.mxu1 %v1425_v7 }
 0xadb   :  { %1243 = vmatprep.subr.mxu1 %v1349_v1 }
 0xb93   :  { %v613_v26 = vpop.f32.mrf.mxu1 }
 0xb94   :  { %v617_v27 = vadd.f32 %v613_v26, %v540_v25 }
 0xb95   :  { %v1209_v28 = vpop.f32.mrf.mxu1 }
 0xb96   :  { %1291 = vtanh.f32 %v617_v27  ;;  %v1091_v30 = vmul.f32 -1.442695, %v617_v27 }
 0xb98   :  { %1293 = vpow2.f32 %v1091_v30 }
 0xba3   :  { %v1292_v29 = vpop.eup %1291 }
 0xba4   :  { %627 = vrot.lane.b32.xlu0 %v1292_v29, %s1351_s10 }
 0xba5   :  { %v1294_v31 = vpop.eup %1293 }
 0xba6   :  { %v621_v32 = vadd.f32 1.0, %v1294_v31  ;;  %v972_v31 = vld [vmem:[%s1585_s4 + $0x18] sm:$0xff] }
 0xba8   :  { %1295 = vrcp.f32 %v621_v32  ;;  %v971_v32 = vld [vmem:[%s1585_s4 + $0x10] sm:$0xff] }
 0xbb5   :  { %v1296_v33 = vpop.eup %1295 }
 0xbb6   :  { %v625_v36 = vmul.f32 %v1296_v33, %v528_v20 }
 0xc16   :  { %v628_v34 = vpop.permute.xlu0 %627 }
 0xc17   :  { %v630_v35 = vmul.f32 %v1296_v33, %v628_v34  ;;  %v969_v34 = vld [vmem:[%s1585_s4] sm:$0xff] }
 0xc19   :  { %632 = vrot.lane.b32.xlu1 %v630_v35, %s1352_s3 }
 0xc8b   :  { %v633_v37 = vpop.permute.xlu1 %632 }
 0xc8c   :  { %v635_v38 = vadd.f32 %v633_v37, %v625_v36 }
 0xc8e   :  { %1297 = vtanh.f32 %v635_v38 }
 0xc9b   :  { %v1298_v39 = vpop.eup %1297 }
 0xc9c   :  { %638 = vrot.lane.b32.xlu0 %v1298_v39, %s1351_s10  ;;  %v1098_v39 = vld [vmem:[%s1586_s5] ss:$0 sm:$0xff] }
 0xd0e   :  { %v639_v40 = vpop.permute.xlu0 %638 }
 0xd0f   :  { %v641_v41 = vmul.f32 %v1296_v33, %v639_v40  ;;  %v970_v33 = vld [vmem:[%s1585_s4 + $0x8] sm:$0xff]  ;;  %s1353_s4 = smov [#allocation4]  }
 0xd10   :  { %s1073_s5 = sshll.u32 %s1353_s4, 4  ;;  %s1074_s5 = int_to_ptr.vmem [resolvable:$true] %s1073_s5 }
 0xd11   :  { %643 = vrot.lane.b32.xlu1 %v641_v41, %s1352_s3  ;;  %s1327_s21 = scalar_lea.vmem %s1074_s5, 128  ;;  %p1332_p1 = scmp.lt.s32.totalorder %s1074_s5, %s1074_s5 }
 0xd12   :  { %p1328_p0 = scmp.ne.s32.totalorder %s1074_s5, %s1327_s21  ;;  %p1333_p2 = scmp.lt.s32.totalorder %s1327_s21, %s1327_s21 }
 0xd14   :  { %p1334_p3 = por %p1333_p2, %p1332_p1 }
 0xd16   :  { %p1335_p4 = pnand %p1334_p3, %p1328_p0 }
 0xd83   :  { %v644_v42 = vpop.permute.xlu1 %643 }
 0xd84   :  { %646 = vst.msk [vmem:[#allocation2 + $0x4] sm:$0x1] %vm217_vm2, %v644_v42  ;;  %1219 = vmatmul.mubr.msk.f32.vlgmr.msra.gmra.mxu0 %vm114_vm3, %v644_v42 }
 0xd85   :  { %1233 = vmatpush3.msra.mxu0 %v1401_v3  ;;  %1240 = vmatprep.mubr.msk.f32.mxu0 %vm1350_vm0, %v1349_v1 }
 0xd86   :  { %1234 = vmatprep.subr.mxu0 %v1349_v1 }
 0xd87   :  { %1235 = vmatpush3.msra.mxu0 %v1410_v5 }
 0xd88   :  { %1236 = vmatprep.subr.mxu0 %v1349_v1 }
 0xd89   :  { %1237 = vmatpush3.msra.mxu0 %v1418_v6 }
 0xd8a   :  { %1238 = vmatprep.subr.mxu0 %v1349_v1 }
 0xd8b   :  { %1239 = vmatpush3.msra.mxu0 %v1425_v7 }
 0xe44   :  { %v720_v44 = vpop.f32.mrf.mxu0 }
 0xe45   :  { %v724_v45 = vadd.f32 %v720_v44, %v647_v43 }
 0xe46   :  { %v1220_v46 = vpop.f32.mrf.mxu0 }
 0xe47   :  { %1299 = vtanh.f32 %v724_v45  ;;  %v1093_v47 = vmul.f32 -1.442695, %v724_v45 }
 0xe49   :  { %1301 = vpow2.f32 %v1093_v47 }
 0xe54   :  { %v1300_v3 = vpop.eup %1299 }
 0xe55   :  { %734 = vrot.lane.b32.xlu0 %v1300_v3, %s1351_s10 }
 0xe56   :  { %v1302_v48 = vpop.eup %1301 }
 0xe57   :  { %v728_v5 = vadd.f32 1.0, %v1302_v48 }
 0xe59   :  { %1303 = vrcp.f32 %v728_v5 }
 0xe66   :  { %v1304_v49 = vpop.eup %1303 }
 0xe67   :  { %v732_v51 = vmul.f32 %v1304_v49, %v635_v38 }
 0xec7   :  { %v735_v50 = vpop.permute.xlu0 %734 }
 0xec8   :  { %v737_v6 = vmul.f32 %v1304_v49, %v735_v50 }
 0xeca   :  { %739 = vrot.lane.b32.xlu1 %v737_v6, %s1352_s3 }
 0xf3c   :  { %v740_v7 = vpop.permute.xlu1 %739 }
 0xf3d   :  { %v742_v52 = vadd.f32 %v740_v7, %v732_v51 }
 0xf3f   :  { %1305 = vtanh.f32 %v742_v52 }
 0xf4c   :  { %v1306_v53 = vpop.eup %1305 }
 0xf4d   :  { %745 = vrot.lane.b32.xlu0 %v1306_v53, %s1351_s10 }
 0xfbf   :  { %v746_v54 = vpop.permute.xlu0 %745 }
 0xfc0   :  { %v748_v55 = vmul.f32 %v1304_v49, %v746_v54 }
 0xfc2   :  { %750 = vrot.lane.b32.xlu1 %v748_v55, %s1352_s3 }
0x1034   :  { %v751_v56 = vpop.permute.xlu1 %750 }
0x1035   :  { %753 = vst.msk [vmem:[#allocation2 + $0x5] sm:$0x1] %vm217_vm2, %v751_v56  ;;  %1230 = vmatmul.mubr.msk.f32.vlgmr.msra.gmra.mxu1 %vm114_vm3, %v751_v56 }
0x1036   :  { %1251 = vmatprep.mubr.msk.f32.mxu1 %vm1350_vm0, %v1349_v1  ;;  %1244 = vmatpush3.msra.mxu1 %v972_v31 }
0x1037   :  { %1245 = vmatprep.subr.mxu1 %v1349_v1 }
0x1038   :  { %1246 = vmatpush3.msra.mxu1 %v971_v32 }
0x1039   :  { %1247 = vmatprep.subr.mxu1 %v1349_v1 }
0x103a   :  { %1248 = vmatpush3.msra.mxu1 %v970_v33 }
0x103b   :  { %1249 = vmatprep.subr.mxu1 %v1349_v1 }
0x103c   :  { %1250 = vmatpush3.msra.mxu1 %v969_v34 }
0x10f5   :  { %v827_v58 = vpop.f32.mrf.mxu1 }
0x10f6   :  { %v831_v59 = vadd.f32 %v827_v58, %v754_v57 }
0x10f7   :  { %v1231_v60 = vpop.f32.mrf.mxu1 }
0x10f8   :  { %1307 = vtanh.f32 %v831_v59  ;;  %v1095_v62 = vmul.f32 -1.442695, %v831_v59 }
0x10fa   :  { %1309 = vpow2.f32 %v1095_v62 }
0x1105   :  { %v1308_v61 = vpop.eup %1307 }
0x1106   :  { %841 = vrot.lane.b32.xlu0 %v1308_v61, %s1351_s10 }
0x1107   :  { %v1310_v63 = vpop.eup %1309 }
0x1108   :  { %v835_v0 = vadd.f32 1.0, %v1310_v63 }
0x110a   :  { %1311 = vrcp.f32 %v835_v0 }
0x1117   :  { %v1312_v2 = vpop.eup %1311 }
0x1118   :  { %v839_v9 = vmul.f32 %v1312_v2, %v742_v52 }
0x1178   :  { %v842_v4 = vpop.permute.xlu0 %841 }
0x1179   :  { %v844_v8 = vmul.f32 %v1312_v2, %v842_v4 }
0x117b   :  { %846 = vrot.lane.b32.xlu1 %v844_v8, %s1352_s3 }
0x11ed   :  { %v847_v10 = vpop.permute.xlu1 %846 }
0x11ee   :  { %v849_v11 = vadd.f32 %v847_v10, %v839_v9 }
0x11f0   :  { %1313 = vtanh.f32 %v849_v11 }
0x11fd   :  { %v1314_v12 = vpop.eup %1313 }
0x11fe   :  { %852 = vrot.lane.b32.xlu0 %v1314_v12, %s1351_s10 }
0x1270   :  { %v853_v13 = vpop.permute.xlu0 %852 }
0x1271   :  { %v855_v14 = vmul.f32 %v1312_v2, %v853_v13 }
0x1273   :  { %857 = vrot.lane.b32.xlu1 %v855_v14, %s1352_s3 }
0x12e5   :  { %v858_v15 = vpop.permute.xlu1 %857 }
0x12e6   :  { %860 = vst.msk [vmem:[#allocation2 + $0x6] sm:$0x1] %vm217_vm2, %v858_v15  ;;  %1241 = vmatmul.mubr.msk.f32.vlgmr.msra.gmra.mxu0 %vm114_vm3, %v858_v15 }
0x13a6   :  { %v934_v17 = vpop.f32.mrf.mxu0 }
0x13a7   :  { %v938_v18 = vadd.f32 %v934_v17, %v861_v16 }
0x13a8   :  { %v1242_v19 = vpop.f32.mrf.mxu0 }
0x13a9   :  { %1315 = vtanh.f32 %v938_v18  ;;  %v1097_v21 = vmul.f32 -1.442695, %v938_v18 }
0x13ab   :  { %1317 = vpow2.f32 %v1097_v21 }
0x13b6   :  { %v1316_v20 = vpop.eup %1315 }
0x13b7   :  { %948 = vrot.lane.b32.xlu0 %v1316_v20, %s1351_s10 }
0x13b8   :  { %v1318_v22 = vpop.eup %1317 }
0x13b9   :  { %v942_v23 = vadd.f32 1.0, %v1318_v22 }
0x13bb   :  { %1319 = vrcp.f32 %v942_v23 }
0x13c8   :  { %v1320_v24 = vpop.eup %1319 }
0x13c9   :  { %v946_v27 = vmul.f32 %v1320_v24, %v849_v11 }
0x1429   :  { %v949_v25 = vpop.permute.xlu0 %948 }
0x142a   :  { %v951_v26 = vmul.f32 %v1320_v24, %v949_v25 }
0x142c   :  { %953 = vrot.lane.b32.xlu1 %v951_v26, %s1352_s3 }
0x149e   :  { %v954_v28 = vpop.permute.xlu1 %953 }
0x149f   :  { %v956_v29 = vadd.f32 %v954_v28, %v946_v27 }
0x14a1   :  { %1321 = vtanh.f32 %v956_v29 }
0x14ae   :  { %v1322_v30 = vpop.eup %1321 }
0x14af   :  { %959 = vrot.lane.b32.xlu0 %v1322_v30, %s1351_s10 }
0x1521   :  { %v960_v35 = vpop.permute.xlu0 %959 }
0x1522   :  { %v962_v36 = vmul.f32 %v1320_v24, %v960_v35 }
0x1524   :  { %964 = vrot.lane.b32.xlu1 %v962_v36, %s1352_s3 }
0x1596   :  { %v965_v37 = vpop.permute.xlu1 %964 }
0x1597   :  { %967 = vst.msk [vmem:[#allocation2 + $0x7] sm:$0x1] %vm217_vm2, %v965_v37 }
0x159e   :  { %v968_v38 = vld [vmem:[#allocation2] sm:$0xff] }
0x159f   :  { %1252 = vmatmul.mubr.msk.f32.vlgmr.msra.gmra.mxu1 %vm114_vm3, %v968_v38 }
0x165f   :  { %v1049_v40 = vpop.f32.mrf.mxu1 }
0x1660   :  { %v1050_v41 = vadd.f32 %v1098_v39, %v1049_v40 }
0x1661   :  { %v1253_v42 = vpop.f32.mrf.mxu1 }
0x1662   :  { %v1054_v1 = vsel %vm1053_vm4, %v1050_v41, -inf }
0x1663   :  { %1055 = vmax.xlane.f32.xlu0 %v1054_v1 }
0x16ec   :  { %v1056_v43 = vpop.xlane.xlu0 %1055 }
0x16ed   :  { %v1057_v44 = vsub.f32 %v1050_v41, %v1056_v43 }
0x16ef   :  { %v1058_v45 = vmul.f32 1.442695, %v1057_v44 }
0x16f1   :  { %1323 = vpow2.f32 %v1058_v45 }
0x16fe   :  { %v1324_v46 = vpop.eup %1323 }
0x16ff   :  { %v1060_v3 = vsel %vm1053_vm4, %v1324_v46, 0.0 }
0x1700   :  { %1061 = vadd.xlane.f32.xlu1 %v1060_v3 }
0x1789   :  { %v1062_v47 = vpop.xlane.xlu1 %1061 }
0x178a   :  { %1325 = vlog2.f32 %v1062_v47 }
0x1797   :  { %v1326_v48 = vpop.eup %1325 }
0x1798   :  { %v1064_v5 = vmul.f32 0.6931472, %v1326_v48 }
0x179a   :  { %v1065_v49 = vsub.f32 %v1057_v44, %v1064_v5 }
0x179c   :  { %1066 = vst.msk [vmem:[#allocation4] sm:$0xff] %vm1053_vm4, %v1065_v49 }
0x179d   :  { %1338 = shalt.err (!%p1335_p4)
}
0x179e   :  { %1076 = dma.vmem_to_hbm [thread:$0]  %s1074_s5, 128, %s1587_s6, [#allocation5]  }
0x179f   :  { %1347 = dma.done.wait [#allocation5], 128  }
0x17a0   :  { %1348 = vsyncadd [#allocation5], 4294967168 }
0x17a1   :  { %1080 = vsyncpa [#allocation5], 1 }

</bundles_post_ra>
